<compile_context>
chip_gen: v7x
topology: tpu7x:2x2x1
jax: 0.10.0
libtpu: 0.0.40
codegen_flags: <defaults>
</compile_context>

<pallas_src>
import functools
import math

import numpy as np
import jax
import jax.numpy as jnp
from jax.experimental import pallas as pl
from jax.experimental.pallas import tpu as pltpu


# ----------------------------------------------------------------------------
# Kernels
# ----------------------------------------------------------------------------

def _dense_kernel(dist_ref, rmat_ref, offt_ref, out_ref, *, coeff):
    """Lane-dense path.

    dist_ref: (bm, rep)  f32   rep distances packed per dense row
    rmat_ref: (rep, W)   bf16  constant 0/1 block-replication matrix, W = rep*G
    offt_ref: (1, W)     f32   gaussian centers tiled rep times
    out_ref : (bm, W)    f32   lane-dense view of (bm*rep, G)
    """
    d = dist_ref[...]                                   # (bm, rep) f32
    rmat = rmat_ref[...]                                # (rep, W)  bf16 (0/1)

    # Exact 3-term bf16 split of the f32 distances.  Each residual subtraction
    # is exact (Sterbenz), so d == hi + mid + lo exactly in f32.
    d_hi = d.astype(jnp.bfloat16)
    r1 = d - d_hi.astype(jnp.float32)
    d_mid = r1.astype(jnp.bfloat16)
    d_lo = (r1 - d_mid.astype(jnp.float32)).astype(jnp.bfloat16)

    # Three single-pass bf16 MXU dots against a 0/1 matrix: each output lane j
    # picks up exactly one chunk value (times 1.0, exact in bf16) plus exact
    # zeros.  (hi + mid) + lo reconstructs the original f32 distance exactly.
    hi = jnp.dot(d_hi, rmat, preferred_element_type=jnp.float32)
    mid = jnp.dot(d_mid, rmat, preferred_element_type=jnp.float32)
    lo = jnp.dot(d_lo, rmat, preferred_element_type=jnp.float32)
    d_rep = (hi + mid) + lo                             # (bm, W) == replicated d

    diff = d_rep - offt_ref[...]
    out_ref[...] = jnp.exp(coeff * diff * diff).astype(out_ref.dtype)


def _rowwise_kernel(dist_ref, off_ref, out_ref, *, coeff):
    """Tiny-n fallback: one distance per row, G gaussians on the lanes."""
    d = dist_ref[...]                                   # (n, 1) f32
    diff = d - off_ref[...]                             # (n, G)
    out_ref[...] = jnp.exp(coeff * diff * diff).astype(out_ref.dtype)


# ----------------------------------------------------------------------------
# Host-side helpers
# ----------------------------------------------------------------------------

def _pick_block_rows(rows, requested, target_blocks=8):
    """Row-block size: multiple of 8 (or full extent), <= requested, and small
    enough that the parallel grid axis has >= target_blocks blocks (megacore)."""
    per = pl.cdiv(rows, target_blocks)
    per = ((per + 7) // 8) * 8
    bm = min(requested, per)
    bm = max(8, (bm // 8) * 8)
    if bm >= rows:
        return rows
    return bm


def _dense_call(flat, offset, coeff, g, rep, block_rows):
    """Lane-dense pallas_call.  flat.shape[0] must be a multiple of rep.
    Returns a (n, g) float32 array (free contiguous reinterpretation)."""
    n = flat.shape[0]
    rows = n // rep
    width = rep * g
    bm = _pick_block_rows(rows, block_rows)

    dist_dense = flat.reshape(rows, rep)
    offt = jnp.tile(offset, rep).reshape(1, width)                     # f32
    rmat = (jnp.arange(width, dtype=jnp.int32)[None, :] // g ==
            jnp.arange(rep, dtype=jnp.int32)[:, None]).astype(jnp.bfloat16)

    out = pl.pallas_call(
        functools.partial(_dense_kernel, coeff=coeff),
        out_shape=jax.ShapeDtypeStruct((rows, width), jnp.float32),
        grid_spec=pltpu.PrefetchScalarGridSpec(
            num_scalar_prefetch=0,
            grid=(pl.cdiv(rows, bm),),
            in_specs=[
                pl.BlockSpec((bm, rep), lambda i: (i, 0)),      # distances
                pl.BlockSpec((rep, width), lambda i: (0, 0)),   # replication (resident)
                pl.BlockSpec((1, width), lambda i: (0, 0)),     # tiled offsets (resident)
            ],
            out_specs=pl.BlockSpec((bm, width), lambda i: (i, 0)),
        ),
        compiler_params=pltpu.CompilerParams(
            dimension_semantics=("parallel",),
            vmem_limit_bytes=32 * 1024 * 1024),
    )(dist_dense, rmat, offt)
    return out.reshape(n, g)   # contiguous reinterpretation: free


def _rowwise_call(flat, offset, coeff, g):
    """Tiny-n fallback (n < rep): single full-extent block."""
    n = flat.shape[0]
    return pl.pallas_call(
        functools.partial(_rowwise_kernel, coeff=coeff),
        out_shape=jax.ShapeDtypeStruct((n, g), jnp.float32),
        grid_spec=pltpu.PrefetchScalarGridSpec(
            num_scalar_prefetch=0,
            grid=(1,),
            in_specs=[
                pl.BlockSpec((n, 1), lambda i: (0, 0)),
                pl.BlockSpec((1, g), lambda i: (0, 0)),
            ],
            out_specs=pl.BlockSpec((n, g), lambda i: (0, 0)),
        ),
    )(flat.reshape(n, 1), offset.reshape(1, g))


def gaussian_smearing(dist, *, start=0.0, stop=5.0, num_gaussians=50,
                      dense_block_rows=512):
    """Pallas TPU implementation of GaussianSmearing.forward.

    dist: any shape.  Returns float32 of shape dist.shape + (num_gaussians,).
    """
    g = num_gaussians
    # Offsets / coeff built once (numpy, f32) exactly like the torch module:
    # linspace in f32, coeff from the f32 first step.  Shared by every path.
    offset_np = np.linspace(start, stop, g, dtype=np.float32)
    step_f32 = float(offset_np[1] - offset_np[0])
    coeff = -0.5 / step_f32 ** 2
    offset = jnp.asarray(offset_np)

    orig_shape = dist.shape
    flat = dist.reshape(-1).astype(jnp.float32)
    n = flat.shape[0]
    if n == 0:
        return jnp.zeros((*orig_shape, g), jnp.float32)

    rep = 128 // math.gcd(g, 128)     # distances packed per lane-dense row
    if n < rep:
        # Tiny input: one masked-lane block, negligible cost.
        out = _rowwise_call(flat, offset, coeff, g)
    elif n % rep == 0:
        # Lane-dense path, no padding, free reshape at the end.
        out = _dense_call(flat, offset, coeff, g, rep, dense_block_rows)
    else:
        # Pad the (small) input to a multiple of rep, run lane-dense, slice back.
        # TODO(synk): the out[:n] slice costs one extra output pass if XLA does
        # not fuse it into the consumer; a tail-only second pallas_call with
        # input_output_aliases would avoid it at the price of more plumbing.
        n_pad = pl.cdiv(n, rep) * rep
        flat_p = jnp.pad(flat, (0, n_pad - n))
        out = _dense_call(flat_p, offset, coeff, g, rep, dense_block_rows)[:n]

    return out.reshape(*orig_shape, g)


# ----------------------------------------------------------------------------
# Reference + self-test
# ----------------------------------------------------------------------------

def _reference(dist, start=0.0, stop=5.0, num_gaussians=50):
    offset_np = np.linspace(start, stop, num_gaussians, dtype=np.float32)
    step_f32 = float(offset_np[1] - offset_np[0])
    coeff = -0.5 / step_f32 ** 2
    d = dist[..., None].astype(jnp.float32) - jnp.asarray(offset_np)
    return jnp.exp(coeff * d * d)


if __name__ == "__main__":
    key = jax.random.PRNGKey(0)
    k1, k2, k3 = jax.random.split(key, 3)

    # Path 1: n = 16 distances (< rep=64)         -> tiny row-wise fallback.
    dist_a = jax.random.uniform(k1, (2, 8), dtype=jnp.float32,
                                minval=0.0, maxval=5.0)
    # Path 2: n = 1024 distances (multiple of 64) -> pure lane-dense kernel.
    dist_b = jax.random.uniform(k2, (16, 64), dtype=jnp.float32,
                                minval=0.0, maxval=5.0)
    # Path 3: n = 210 distances (not a multiple)  -> pad + lane-dense + slice.
    dist_c = jax.random.uniform(k3, (3, 70), dtype=jnp.float32,
                                minval=0.0, maxval=5.0)

    for dist in (dist_a, dist_b, dist_c):
        out = jax.block_until_ready(gaussian_smearing(dist))
        ref = _reference(dist)
        assert out.shape == (*dist.shape, 50), out.shape
        assert jnp.allclose(out, ref, atol=1e-5, rtol=1e-5), float(
            jnp.max(jnp.abs(out - ref)))

    print("KERNEL_OK")
</pallas_src>

<mosaic_0001>
module attributes {stable_mosaic.version = 11 : i64} {
  func.func @_rowwise_kernel(%arg0: i32, %arg1: memref<16x1xf32, #tpu.memory_space<vmem>>, %arg2: memref<1x50xf32, #tpu.memory_space<vmem>>, %arg3: memref<16x50xf32, #tpu.memory_space<vmem>>) attributes {dimension_semantics = [#tpu.dimension_semantics<arbitrary>], iteration_bounds = array<i64: 1>, scalar_prefetch = 0 : i64, scratch_operands = 0 : i64, tpu.core_type = #tpu.core_type<tc>, window_params = [{pipeline_mode = #tpu.pipeline_mode<synchronous>, transform_indices = @transform_0, window_bounds = array<i64: 16, 1>}, {pipeline_mode = #tpu.pipeline_mode<synchronous>, transform_indices = @transform_1, window_bounds = array<i64: 1, 50>}, {pipeline_mode = #tpu.pipeline_mode<synchronous>, transform_indices = @transform_2, window_bounds = array<i64: 16, 50>}]} {
    %c0 = arith.constant 0 : index
    %c0_0 = arith.constant 0 : index
    %0 = vector.load %arg1[%c0, %c0_0] : memref<16x1xf32, #tpu.memory_space<vmem>>, vector<16x1xf32>
    %c0_1 = arith.constant 0 : index
    %c0_2 = arith.constant 0 : index
    %1 = vector.load %arg2[%c0_1, %c0_2] : memref<1x50xf32, #tpu.memory_space<vmem>>, vector<1x50xf32>
    %2 = vector.broadcast %0 : vector<16x1xf32> to vector<16x50xf32>
    %3 = vector.broadcast %1 : vector<1x50xf32> to vector<16x50xf32>
    %4 = arith.subf %2, %3 : vector<16x50xf32>
    %cst = arith.constant -48.0199966 : f32
    %5 = vector.broadcast %cst : f32 to vector<16x50xf32>
    %6 = arith.mulf %5, %4 : vector<16x50xf32>
    %7 = arith.mulf %6, %4 : vector<16x50xf32>
    %8 = math.exp %7 : vector<16x50xf32>
    %c0_3 = arith.constant 0 : index
    %c0_4 = arith.constant 0 : index
    %9 = vector.load %arg3[%c0_3, %c0_4] : memref<16x50xf32, #tpu.memory_space<vmem>>, vector<16x50xf32>
    tpu.vector_store %arg3[%c0_3, %c0_4], %8 {strides = array<i32>} : memref<16x50xf32, #tpu.memory_space<vmem>>, vector<16x50xf32>,
    return
  }
  func.func @transform_0(%arg0: i32) -> (i32, i32) {
    %c0_i32 = arith.constant 0 : i32
    %c0_i32_0 = arith.constant 0 : i32
    %c0_i32_1 = arith.constant 0 : i32
    return %c0_i32, %c0_i32_0 : i32, i32
  }
  func.func @transform_1(%arg0: i32) -> (i32, i32) {
    %c0_i32 = arith.constant 0 : i32
    %c0_i32_0 = arith.constant 0 : i32
    %c0_i32_1 = arith.constant 0 : i32
    return %c0_i32, %c0_i32_0 : i32, i32
  }
  func.func @transform_2(%arg0: i32) -> (i32, i32) {
    %c0_i32 = arith.constant 0 : i32
    %c0_i32_0 = arith.constant 0 : i32
    %c0_i32_1 = arith.constant 0 : i32
    return %c0_i32, %c0_i32_0 : i32, i32
  }
}

</mosaic_0001>

<bundles_post_ra>
// kernel: tpu_custom_call.1
= control target key start
LH: loop header
LB: loop body
LE: loop exit
PB: predicated region body
PF: predicated region fallthrough
CT: control target
= control target key end

     0   :  { %v94_v1 = vmov 0   ;;  %s134_s0 = inlined_call_operand.vmem [shape: f32[16,1], index: 0, kind: input, shape index: {}]   ;;  %s135_s1 = inlined_call_operand.vmem [shape: f32[1,50], index: 1, kind: input, shape index: {}]   ;;  %s136_s2 = inlined_call_operand.hbm [shape: f32[16,50], index: 2, kind: output, shape index: {}]  }
   0x1   :  { %v12_v0 = vld [vmem:[%s134_s0] sm:$0xff]  ;;  %65 = vset.pattern.permute.xlu0 %v94_v1 }
   0x2   :  { %7 = vsyncpa [#allocation3], 0  ;;  %17 = vperm.xlu0 %65, %v12_v0   ;;  %v13_v2 = vld [vmem:[%s134_s0 + $0x8] sm:$0xff]  ;;  %v60_v3 = vld [vmem:[%s135_s1] ss:$0 sm:$0xff]  ;;  %vm41_vm0 = vcmask 408576  }
   0x3   :  { %s95_s15 = smov [#allocation2]  }
   0x4   :  { %s49_s0 = sshll.u32 %s95_s15, 4  ;;  %s50_s0 = int_to_ptr.vmem [resolvable:$true] %s49_s0 }
   0x5   :  { %s70_s1 = scalar_lea.vmem %s50_s0, 256  ;;  %p75_p1 = scmp.lt.s32.totalorder %s50_s0, %s50_s0 }
   0x6   :  { %22 = vperm.xlu0 %65, %v13_v2   ;;  %p71_p0 = scmp.ne.s32.totalorder %s50_s0, %s70_s1  ;;  %p76_p2 = scmp.lt.s32.totalorder %s70_s1, %s70_s1 }
   0x8   :  { %p77_p3 = por %p76_p2, %p75_p1 }
   0xa   :  { %p78_p4 = pnand %p77_p3, %p71_p0 }
  0x81   :  { %v18_v4 = vpop.permute.xlu0 %17 }
  0x82   :  { %v31_v5 = vsub.f32 %v18_v4, %v60_v3 }
  0x84   :  { %v33_v6 = vmul.f32 -48.019997, %v31_v5 }
  0x85   :  { %v23_v7 = vpop.permute.xlu0 %22 }
  0x86   :  { %v35_v8 = vmul.f32 %v33_v6, %v31_v5  ;;  %v32_v9 = vsub.f32 %v23_v7, %v60_v3 }
  0x88   :  { %v37_v10 = vmul.f32 1.442695, %v35_v8  ;;  %v34_v11 = vmul.f32 -48.019997, %v32_v9 }
  0x8a   :  { %66 = vpow2.f32 %v37_v10  ;;  %v36_v12 = vmul.f32 %v34_v11, %v32_v9 }
  0x8c   :  { %v39_v13 = vmul.f32 1.442695, %v36_v12 }
  0x8e   :  { %68 = vpow2.f32 %v39_v13 }
  0x94   :  { %v67_v14 = vpop.eup %66 }
  0x95   :  { %42 = vst.msk [vmem:[#allocation2] sm:$0xff] %vm41_vm0, %v67_v14 }
  0x98   :  { %v69_v15 = vpop.eup %68 }
  0x99   :  { %43 = vst.msk [vmem:[#allocation2 + $0x8] sm:$0xff] %vm41_vm0, %v69_v15 }
  0x9a   :  { %81 = shalt.err (!%p78_p4)
}
  0x9b   :  { %s82_s18 = scalar_lea.hbm %s136_s2, 256 }
  0x9c   :  { %p83_p5 = scmp.ne.s32.totalorder %s136_s2, %s82_s18  ;;  %p86_p6 = scmp.lt.u32.totalorder %s82_s18, %s136_s2 }
  0x9e   :  { %p88_p7 = pnand %p86_p6, %p83_p5 }
  0xa0   :  { %91 = shalt.err (!%p88_p7)
}
  0xa1   :  { %s96_s23 = smov 128   ;;  %s97_s24 = smov 8  }
  0xa2   :  { %55 = dma.vmem_to_hbm [thread:$0]  %s50_s0, 256, %s136_s2, [#allocation3], %s96_s23, %s96_s23, %s97_s24  }
  0xa3   :  { %92 = dma.done.wait [#allocation3], 256  }
  0xa4   :  { %93 = vsyncadd [#allocation3], 4294967040 }
  0xa5   :  { %59 = vsyncpa [#allocation3], 1 }

</bundles_post_ra>
